<compile_context>
chip_gen: v7x
topology: tpu7x:2x2x1
jax: 0.10.0
libtpu: 0.0.40
codegen_flags: <defaults>
</compile_context>

<pallas_src>
import functools

import jax
import jax.numpy as jnp
from jax.experimental import pallas as pl
from jax.experimental.pallas import tpu as pltpu


# -----------------------------------------------------------------------------
# Pallas kernel: one batch element, full (cin, H, W) -> (cout, H, W) 1x1 conv
# -----------------------------------------------------------------------------
def _conv1x1_kernel(w_ref, b_ref, x_ref, o_ref, *, cin, cout):
    """w_ref: (cout*cin,) SMEM, b_ref: (cout,) SMEM,
    x_ref: (1, cin, H, W) VMEM, o_ref: (1, cout, H, W) VMEM."""
    # Hoist the input planes once; each is a full (H, W) f32 slab that gets
    # reused for every output channel.
    xs = [x_ref[0, ci] for ci in range(cin)]

    # Statically unrolled channel loops (cin, cout <= ~16 here).  Bias is the
    # accumulator seed; each output plane is stored exactly once.
    for co in range(cout):
        acc = xs[0] * w_ref[co * cin + 0] + b_ref[co]
        for ci in range(1, cin):
            acc = acc + xs[ci] * w_ref[co * cin + ci]
        o_ref[0, co] = acc


# -----------------------------------------------------------------------------
# Wrapper (== OutConv.forward)
# -----------------------------------------------------------------------------
def out_conv(x, w, b):
    """x: (N, cin, H, W) f32; w: (cout, cin, 1, 1) or (cout, cin); b: (cout,).
    Returns (N, cout, H, W) f32, matching nn.Conv2d(cin, cout, kernel_size=1)."""
    N, cin, H, W = x.shape
    w2 = jnp.asarray(w, jnp.float32).reshape(w.shape[0], -1)   # (cout, cin)
    cout = w2.shape[0]
    assert w2.shape[1] == cin, (w2.shape, cin)

    kern = functools.partial(_conv1x1_kernel, cin=cin, cout=cout)
    smem = pl.BlockSpec(memory_space=pltpu.MemorySpace.SMEM)
    return pl.pallas_call(
        kern,
        out_shape=jax.ShapeDtypeStruct((N, cout, H, W), jnp.float32),
        grid=(N,),
        in_specs=[smem, smem,
                  pl.BlockSpec((1, cin, H, W), lambda n: (n, 0, 0, 0))],
        out_specs=pl.BlockSpec((1, cout, H, W), lambda n: (n, 0, 0, 0)),
        compiler_params=pltpu.CompilerParams(
            dimension_semantics=("parallel",)),   # 2-TC megacore on v7x
    )(w2.reshape(-1), jnp.asarray(b, jnp.float32), x.astype(jnp.float32))


if __name__ == "__main__":
    # Small shapes consistent with OutConv; W=128 keeps output stores
    # lane-dense (unmasked vst) as recommended by the perf review.
    N, CIN, COUT, H, W = 2, 8, 4, 16, 128

    key = jax.random.PRNGKey(0)
    kx, kw, kb = jax.random.split(key, 3)
    x = jax.random.normal(kx, (N, CIN, H, W), jnp.float32)
    w = jax.random.normal(kw, (COUT, CIN, 1, 1), jnp.float32) / jnp.sqrt(float(CIN))
    b = 0.01 * jax.random.normal(kb, (COUT,), jnp.float32)

    out = jax.jit(out_conv)(x, w, b)
    out = jax.block_until_ready(out)
    assert out.shape == (N, COUT, H, W), out.shape

    # Reference check against plain-JAX 1x1 conv.
    ref = jnp.einsum("oi,nihw->nohw", w.reshape(COUT, CIN), x) + b[None, :, None, None]
    assert bool(jnp.all(jnp.isfinite(out)))
    assert bool(jnp.allclose(out, ref, atol=1e-3, rtol=1e-3))
    print("KERNEL_OK")
</pallas_src>

<mosaic_0001>
module attributes {stable_mosaic.version = 11 : i64} {
  func.func @_conv1x1_kernel(%arg0: i32, %arg1: memref<32xf32, #tpu.memory_space<smem>>, %arg2: memref<4xf32, #tpu.memory_space<smem>>, %arg3: memref<1x8x16x128xf32, #tpu.memory_space<vmem>>, %arg4: memref<1x4x16x128xf32, #tpu.memory_space<vmem>>) attributes {dimension_semantics = [#tpu.dimension_semantics<parallel>], iteration_bounds = array<i64: 2>, scalar_prefetch = 0 : i64, scratch_operands = 0 : i64, tpu.core_type = #tpu.core_type<tc>, window_params = [{transform_indices = @transform_0, window_bounds = array<i64: 32>}, {transform_indices = @transform_1, window_bounds = array<i64: 4>}, {transform_indices = @transform_2, window_bounds = array<i64: 1, 8, 16, 128>}, {transform_indices = @transform_3, window_bounds = array<i64: 1, 4, 16, 128>}]} {
    %c0 = arith.constant 0 : index
    %c0_0 = arith.constant 0 : index
    %c0_1 = arith.constant 0 : index
    %c0_2 = arith.constant 0 : index
    %0 = vector.load %arg3[%c0, %c0_0, %c0_1, %c0_2] : memref<1x8x16x128xf32, #tpu.memory_space<vmem>>, vector<1x1x16x128xf32>
    %1 = vector.shape_cast %0 : vector<1x1x16x128xf32> to vector<16x128xf32>
    %c0_3 = arith.constant 0 : index
    %c1 = arith.constant 1 : index
    %c0_4 = arith.constant 0 : index
    %c0_5 = arith.constant 0 : index
    %2 = vector.load %arg3[%c0_3, %c1, %c0_4, %c0_5] : memref<1x8x16x128xf32, #tpu.memory_space<vmem>>, vector<1x1x16x128xf32>
    %3 = vector.shape_cast %2 : vector<1x1x16x128xf32> to vector<16x128xf32>
    %c0_6 = arith.constant 0 : index
    %c2 = arith.constant 2 : index
    %c0_7 = arith.constant 0 : index
    %c0_8 = arith.constant 0 : index
    %4 = vector.load %arg3[%c0_6, %c2, %c0_7, %c0_8] : memref<1x8x16x128xf32, #tpu.memory_space<vmem>>, vector<1x1x16x128xf32>
    %5 = vector.shape_cast %4 : vector<1x1x16x128xf32> to vector<16x128xf32>
    %c0_9 = arith.constant 0 : index
    %c3 = arith.constant 3 : index
    %c0_10 = arith.constant 0 : index
    %c0_11 = arith.constant 0 : index
    %6 = vector.load %arg3[%c0_9, %c3, %c0_10, %c0_11] : memref<1x8x16x128xf32, #tpu.memory_space<vmem>>, vector<1x1x16x128xf32>
    %7 = vector.shape_cast %6 : vector<1x1x16x128xf32> to vector<16x128xf32>
    %c0_12 = arith.constant 0 : index
    %c4 = arith.constant 4 : index
    %c0_13 = arith.constant 0 : index
    %c0_14 = arith.constant 0 : index
    %8 = vector.load %arg3[%c0_12, %c4, %c0_13, %c0_14] : memref<1x8x16x128xf32, #tpu.memory_space<vmem>>, vector<1x1x16x128xf32>
    %9 = vector.shape_cast %8 : vector<1x1x16x128xf32> to vector<16x128xf32>
    %c0_15 = arith.constant 0 : index
    %c5 = arith.constant 5 : index
    %c0_16 = arith.constant 0 : index
    %c0_17 = arith.constant 0 : index
    %10 = vector.load %arg3[%c0_15, %c5, %c0_16, %c0_17] : memref<1x8x16x128xf32, #tpu.memory_space<vmem>>, vector<1x1x16x128xf32>
    %11 = vector.shape_cast %10 : vector<1x1x16x128xf32> to vector<16x128xf32>
    %c0_18 = arith.constant 0 : index
    %c6 = arith.constant 6 : index
    %c0_19 = arith.constant 0 : index
    %c0_20 = arith.constant 0 : index
    %12 = vector.load %arg3[%c0_18, %c6, %c0_19, %c0_20] : memref<1x8x16x128xf32, #tpu.memory_space<vmem>>, vector<1x1x16x128xf32>
    %13 = vector.shape_cast %12 : vector<1x1x16x128xf32> to vector<16x128xf32>
    %c0_21 = arith.constant 0 : index
    %c7 = arith.constant 7 : index
    %c0_22 = arith.constant 0 : index
    %c0_23 = arith.constant 0 : index
    %14 = vector.load %arg3[%c0_21, %c7, %c0_22, %c0_23] : memref<1x8x16x128xf32, #tpu.memory_space<vmem>>, vector<1x1x16x128xf32>
    %15 = vector.shape_cast %14 : vector<1x1x16x128xf32> to vector<16x128xf32>
    %c0_24 = arith.constant 0 : index
    %16 = memref.load %arg1[%c0_24] : memref<32xf32, #tpu.memory_space<smem>>
    %17 = vector.broadcast %16 : f32 to vector<16x128xf32>
    %18 = arith.mulf %1, %17 : vector<16x128xf32>
    %c0_25 = arith.constant 0 : index
    %19 = memref.load %arg2[%c0_25] : memref<4xf32, #tpu.memory_space<smem>>
    %20 = vector.broadcast %19 : f32 to vector<16x128xf32>
    %21 = arith.addf %18, %20 : vector<16x128xf32>
    %c1_26 = arith.constant 1 : index
    %22 = memref.load %arg1[%c1_26] : memref<32xf32, #tpu.memory_space<smem>>
    %23 = vector.broadcast %22 : f32 to vector<16x128xf32>
    %24 = arith.mulf %3, %23 : vector<16x128xf32>
    %25 = arith.addf %21, %24 : vector<16x128xf32>
    %c2_27 = arith.constant 2 : index
    %26 = memref.load %arg1[%c2_27] : memref<32xf32, #tpu.memory_space<smem>>
    %27 = vector.broadcast %26 : f32 to vector<16x128xf32>
    %28 = arith.mulf %5, %27 : vector<16x128xf32>
    %29 = arith.addf %25, %28 : vector<16x128xf32>
    %c3_28 = arith.constant 3 : index
    %30 = memref.load %arg1[%c3_28] : memref<32xf32, #tpu.memory_space<smem>>
    %31 = vector.broadcast %30 : f32 to vector<16x128xf32>
    %32 = arith.mulf %7, %31 : vector<16x128xf32>
    %33 = arith.addf %29, %32 : vector<16x128xf32>
    %c4_29 = arith.constant 4 : index
    %34 = memref.load %arg1[%c4_29] : memref<32xf32, #tpu.memory_space<smem>>
    %35 = vector.broadcast %34 : f32 to vector<16x128xf32>
    %36 = arith.mulf %9, %35 : vector<16x128xf32>
    %37 = arith.addf %33, %36 : vector<16x128xf32>
    %c5_30 = arith.constant 5 : index
    %38 = memref.load %arg1[%c5_30] : memref<32xf32, #tpu.memory_space<smem>>
    %39 = vector.broadcast %38 : f32 to vector<16x128xf32>
    %40 = arith.mulf %11, %39 : vector<16x128xf32>
    %41 = arith.addf %37, %40 : vector<16x128xf32>
    %c6_31 = arith.constant 6 : index
    %42 = memref.load %arg1[%c6_31] : memref<32xf32, #tpu.memory_space<smem>>
    %43 = vector.broadcast %42 : f32 to vector<16x128xf32>
    %44 = arith.mulf %13, %43 : vector<16x128xf32>
    %45 = arith.addf %41, %44 : vector<16x128xf32>
    %c7_32 = arith.constant 7 : index
    %46 = memref.load %arg1[%c7_32] : memref<32xf32, #tpu.memory_space<smem>>
    %47 = vector.broadcast %46 : f32 to vector<16x128xf32>
    %48 = arith.mulf %15, %47 : vector<16x128xf32>
    %49 = arith.addf %45, %48 : vector<16x128xf32>
    %c0_33 = arith.constant 0 : index
    %c0_34 = arith.constant 0 : index
    %c0_35 = arith.constant 0 : index
    %c0_36 = arith.constant 0 : index
    %50 = vector.load %arg4[%c0_33, %c0_34, %c0_35, %c0_36] : memref<1x4x16x128xf32, #tpu.memory_space<vmem>>, vector<1x1x16x128xf32>
    %51 = vector.shape_cast %50 : vector<1x1x16x128xf32> to vector<16x128xf32>
    %52 = vector.shape_cast %49 : vector<16x128xf32> to vector<1x1x16x128xf32>
    tpu.vector_store %arg4[%c0_33, %c0_34, %c0_35, %c0_36], %52 {strides = array<i32>} : memref<1x4x16x128xf32, #tpu.memory_space<vmem>>, vector<1x1x16x128xf32>,
    %c8 = arith.constant 8 : index
    %53 = memref.load %arg1[%c8] : memref<32xf32, #tpu.memory_space<smem>>
    %54 = vector.broadcast %53 : f32 to vector<16x128xf32>
    %55 = arith.mulf %1, %54 : vector<16x128xf32>
    %c1_37 = arith.constant 1 : index
    %56 = memref.load %arg2[%c1_37] : memref<4xf32, #tpu.memory_space<smem>>
    %57 = vector.broadcast %56 : f32 to vector<16x128xf32>
    %58 = arith.addf %55, %57 : vector<16x128xf32>
    %c9 = arith.constant 9 : index
    %59 = memref.load %arg1[%c9] : memref<32xf32, #tpu.memory_space<smem>>
    %60 = vector.broadcast %59 : f32 to vector<16x128xf32>
    %61 = arith.mulf %3, %60 : vector<16x128xf32>
    %62 = arith.addf %58, %61 : vector<16x128xf32>
    %c10 = arith.constant 10 : index
    %63 = memref.load %arg1[%c10] : memref<32xf32, #tpu.memory_space<smem>>
    %64 = vector.broadcast %63 : f32 to vector<16x128xf32>
    %65 = arith.mulf %5, %64 : vector<16x128xf32>
    %66 = arith.addf %62, %65 : vector<16x128xf32>
    %c11 = arith.constant 11 : index
    %67 = memref.load %arg1[%c11] : memref<32xf32, #tpu.memory_space<smem>>
    %68 = vector.broadcast %67 : f32 to vector<16x128xf32>
    %69 = arith.mulf %7, %68 : vector<16x128xf32>
    %70 = arith.addf %66, %69 : vector<16x128xf32>
    %c12 = arith.constant 12 : index
    %71 = memref.load %arg1[%c12] : memref<32xf32, #tpu.memory_space<smem>>
    %72 = vector.broadcast %71 : f32 to vector<16x128xf32>
    %73 = arith.mulf %9, %72 : vector<16x128xf32>
    %74 = arith.addf %70, %73 : vector<16x128xf32>
    %c13 = arith.constant 13 : index
    %75 = memref.load %arg1[%c13] : memref<32xf32, #tpu.memory_space<smem>>
    %76 = vector.broadcast %75 : f32 to vector<16x128xf32>
    %77 = arith.mulf %11, %76 : vector<16x128xf32>
    %78 = arith.addf %74, %77 : vector<16x128xf32>
    %c14 = arith.constant 14 : index
    %79 = memref.load %arg1[%c14] : memref<32xf32, #tpu.memory_space<smem>>
    %80 = vector.broadcast %79 : f32 to vector<16x128xf32>
    %81 = arith.mulf %13, %80 : vector<16x128xf32>
    %82 = arith.addf %78, %81 : vector<16x128xf32>
    %c15 = arith.constant 15 : index
    %83 = memref.load %arg1[%c15] : memref<32xf32, #tpu.memory_space<smem>>
    %84 = vector.broadcast %83 : f32 to vector<16x128xf32>
    %85 = arith.mulf %15, %84 : vector<16x128xf32>
    %86 = arith.addf %82, %85 : vector<16x128xf32>
    %c0_38 = arith.constant 0 : index
    %c1_39 = arith.constant 1 : index
    %c0_40 = arith.constant 0 : index
    %c0_41 = arith.constant 0 : index
    %87 = vector.load %arg4[%c0_38, %c1_39, %c0_40, %c0_41] : memref<1x4x16x128xf32, #tpu.memory_space<vmem>>, vector<1x1x16x128xf32>
    %88 = vector.shape_cast %87 : vector<1x1x16x128xf32> to vector<16x128xf32>
    %89 = vector.shape_cast %86 : vector<16x128xf32> to vector<1x1x16x128xf32>
    tpu.vector_store %arg4[%c0_38, %c1_39, %c0_40, %c0_41], %89 {strides = array<i32>} : memref<1x4x16x128xf32, #tpu.memory_space<vmem>>, vector<1x1x16x128xf32>,
    %c16 = arith.constant 16 : index
    %90 = memref.load %arg1[%c16] : memref<32xf32, #tpu.memory_space<smem>>
    %91 = vector.broadcast %90 : f32 to vector<16x128xf32>
    %92 = arith.mulf %1, %91 : vector<16x128xf32>
    %c2_42 = arith.constant 2 : index
    %93 = memref.load %arg2[%c2_42] : memref<4xf32, #tpu.memory_space<smem>>
    %94 = vector.broadcast %93 : f32 to vector<16x128xf32>
    %95 = arith.addf %92, %94 : vector<16x128xf32>
    %c17 = arith.constant 17 : index
    %96 = memref.load %arg1[%c17] : memref<32xf32, #tpu.memory_space<smem>>
    %97 = vector.broadcast %96 : f32 to vector<16x128xf32>
    %98 = arith.mulf %3, %97 : vector<16x128xf32>
    %99 = arith.addf %95, %98 : vector<16x128xf32>
    %c18 = arith.constant 18 : index
    %100 = memref.load %arg1[%c18] : memref<32xf32, #tpu.memory_space<smem>>
    %101 = vector.broadcast %100 : f32 to vector<16x128xf32>
    %102 = arith.mulf %5, %101 : vector<16x128xf32>
    %103 = arith.addf %99, %102 : vector<16x128xf32>
    %c19 = arith.constant 19 : index
    %104 = memref.load %arg1[%c19] : memref<32xf32, #tpu.memory_space<smem>>
    %105 = vector.broadcast %104 : f32 to vector<16x128xf32>
    %106 = arith.mulf %7, %105 : vector<16x128xf32>
    %107 = arith.addf %103, %106 : vector<16x128xf32>
    %c20 = arith.constant 20 : index
    %108 = memref.load %arg1[%c20] : memref<32xf32, #tpu.memory_space<smem>>
    %109 = vector.broadcast %108 : f32 to vector<16x128xf32>
    %110 = arith.mulf %9, %109 : vector<16x128xf32>
    %111 = arith.addf %107, %110 : vector<16x128xf32>
    %c21 = arith.constant 21 : index
    %112 = memref.load %arg1[%c21] : memref<32xf32, #tpu.memory_space<smem>>
    %113 = vector.broadcast %112 : f32 to vector<16x128xf32>
    %114 = arith.mulf %11, %113 : vector<16x128xf32>
    %115 = arith.addf %111, %114 : vector<16x128xf32>
    %c22 = arith.constant 22 : index
    %116 = memref.load %arg1[%c22] : memref<32xf32, #tpu.memory_space<smem>>
    %117 = vector.broadcast %116 : f32 to vector<16x128xf32>
    %118 = arith.mulf %13, %117 : vector<16x128xf32>
    %119 = arith.addf %115, %118 : vector<16x128xf32>
    %c23 = arith.constant 23 : index
    %120 = memref.load %arg1[%c23] : memref<32xf32, #tpu.memory_space<smem>>
    %121 = vector.broadcast %120 : f32 to vector<16x128xf32>
    %122 = arith.mulf %15, %121 : vector<16x128xf32>
    %123 = arith.addf %119, %122 : vector<16x128xf32>
    %c0_43 = arith.constant 0 : index
    %c2_44 = arith.constant 2 : index
    %c0_45 = arith.constant 0 : index
    %c0_46 = arith.constant 0 : index
    %124 = vector.load %arg4[%c0_43, %c2_44, %c0_45, %c0_46] : memref<1x4x16x128xf32, #tpu.memory_space<vmem>>, vector<1x1x16x128xf32>
    %125 = vector.shape_cast %124 : vector<1x1x16x128xf32> to vector<16x128xf32>
    %126 = vector.shape_cast %123 : vector<16x128xf32> to vector<1x1x16x128xf32>
    tpu.vector_store %arg4[%c0_43, %c2_44, %c0_45, %c0_46], %126 {strides = array<i32>} : memref<1x4x16x128xf32, #tpu.memory_space<vmem>>, vector<1x1x16x128xf32>,
    %c24 = arith.constant 24 : index
    %127 = memref.load %arg1[%c24] : memref<32xf32, #tpu.memory_space<smem>>
    %128 = vector.broadcast %127 : f32 to vector<16x128xf32>
    %129 = arith.mulf %1, %128 : vector<16x128xf32>
    %c3_47 = arith.constant 3 : index
    %130 = memref.load %arg2[%c3_47] : memref<4xf32, #tpu.memory_space<smem>>
    %131 = vector.broadcast %130 : f32 to vector<16x128xf32>
    %132 = arith.addf %129, %131 : vector<16x128xf32>
    %c25 = arith.constant 25 : index
    %133 = memref.load %arg1[%c25] : memref<32xf32, #tpu.memory_space<smem>>
    %134 = vector.broadcast %133 : f32 to vector<16x128xf32>
    %135 = arith.mulf %3, %134 : vector<16x128xf32>
    %136 = arith.addf %132, %135 : vector<16x128xf32>
    %c26 = arith.constant 26 : index
    %137 = memref.load %arg1[%c26] : memref<32xf32, #tpu.memory_space<smem>>
    %138 = vector.broadcast %137 : f32 to vector<16x128xf32>
    %139 = arith.mulf %5, %138 : vector<16x128xf32>
    %140 = arith.addf %136, %139 : vector<16x128xf32>
    %c27 = arith.constant 27 : index
    %141 = memref.load %arg1[%c27] : memref<32xf32, #tpu.memory_space<smem>>
    %142 = vector.broadcast %141 : f32 to vector<16x128xf32>
    %143 = arith.mulf %7, %142 : vector<16x128xf32>
    %144 = arith.addf %140, %143 : vector<16x128xf32>
    %c28 = arith.constant 28 : index
    %145 = memref.load %arg1[%c28] : memref<32xf32, #tpu.memory_space<smem>>
    %146 = vector.broadcast %145 : f32 to vector<16x128xf32>
    %147 = arith.mulf %9, %146 : vector<16x128xf32>
    %148 = arith.addf %144, %147 : vector<16x128xf32>
    %c29 = arith.constant 29 : index
    %149 = memref.load %arg1[%c29] : memref<32xf32, #tpu.memory_space<smem>>
    %150 = vector.broadcast %149 : f32 to vector<16x128xf32>
    %151 = arith.mulf %11, %150 : vector<16x128xf32>
    %152 = arith.addf %148, %151 : vector<16x128xf32>
    %c30 = arith.constant 30 : index
    %153 = memref.load %arg1[%c30] : memref<32xf32, #tpu.memory_space<smem>>
    %154 = vector.broadcast %153 : f32 to vector<16x128xf32>
    %155 = arith.mulf %13, %154 : vector<16x128xf32>
    %156 = arith.addf %152, %155 : vector<16x128xf32>
    %c31 = arith.constant 31 : index
    %157 = memref.load %arg1[%c31] : memref<32xf32, #tpu.memory_space<smem>>
    %158 = vector.broadcast %157 : f32 to vector<16x128xf32>
    %159 = arith.mulf %15, %158 : vector<16x128xf32>
    %160 = arith.addf %156, %159 : vector<16x128xf32>
    %c0_48 = arith.constant 0 : index
    %c3_49 = arith.constant 3 : index
    %c0_50 = arith.constant 0 : index
    %c0_51 = arith.constant 0 : index
    %161 = vector.load %arg4[%c0_48, %c3_49, %c0_50, %c0_51] : memref<1x4x16x128xf32, #tpu.memory_space<vmem>>, vector<1x1x16x128xf32>
    %162 = vector.shape_cast %161 : vector<1x1x16x128xf32> to vector<16x128xf32>
    %163 = vector.shape_cast %160 : vector<16x128xf32> to vector<1x1x16x128xf32>
    tpu.vector_store %arg4[%c0_48, %c3_49, %c0_50, %c0_51], %163 {strides = array<i32>} : memref<1x4x16x128xf32, #tpu.memory_space<vmem>>, vector<1x1x16x128xf32>,
    return
  }
  func.func @transform_0(%arg0: i32) -> i32 {
    %c0_i32 = arith.constant 0 : i32
    %c0_i32_0 = arith.constant 0 : i32
    return %c0_i32 : i32
  }
  func.func @transform_1(%arg0: i32) -> i32 {
    %c0_i32 = arith.constant 0 : i32
    %c0_i32_0 = arith.constant 0 : i32
    return %c0_i32 : i32
  }
  func.func @transform_2(%arg0: i32) -> (i32, i32, i32, i32) {
    %c0_i32 = arith.constant 0 : i32
    %c0_i32_0 = arith.constant 0 : i32
    %c0_i32_1 = arith.constant 0 : i32
    %c0_i32_2 = arith.constant 0 : i32
    return %arg0, %c0_i32, %c0_i32_0, %c0_i32_1 : i32, i32, i32, i32
  }
  func.func @transform_3(%arg0: i32) -> (i32, i32, i32, i32) {
    %c0_i32 = arith.constant 0 : i32
    %c0_i32_0 = arith.constant 0 : i32
    %c0_i32_1 = arith.constant 0 : i32
    %c0_i32_2 = arith.constant 0 : i32
    return %arg0, %c0_i32, %c0_i32_0, %c0_i32_1 : i32, i32, i32, i32
  }
}

</mosaic_0001>

<bundles_post_ra>
// kernel: out_conv.1
= control target key start
LH: loop header
LB: loop body
LE: loop exit
PB: predicated region body
PF: predicated region fallthrough
CT: control target
= control target key end

     0   :  { %8 = vsyncpa [#allocation5], 0  ;;  %s1305_s0 = inlined_call_operand.vmem [shape: f32[32], index: 0, kind: input, shape index: {}]   ;;  %s1306_s1 = inlined_call_operand.vmem [shape: f32[4], index: 1, kind: input, shape index: {}]   ;;  %s1307_s2 = inlined_call_operand.hbm [shape: f32[2,8,16,128], index: 2, kind: input, shape index: {}]   ;;  %s1308_s3 = inlined_call_operand.hbm [shape: f32[2,4,16,128], index: 3, kind: output, shape index: {}]  }
   0x1   :  { %9 = vsyncpa [#allocation7], 0 }
   0x2   :  { %10 = vsyncpa [#allocation3], 0 }
   0x3   :  { %12 = vsyncpa [#allocation3 + $0x1], 0 }
   0x4   :  { %13 = vsyncpa [#allocation4], 0 }
   0x5   :  { %15 = vsyncpa [#allocation4 + $0x1], 0  ;;  %s868_s12 = smov 0   ;;  %s870_s13 = smov 0  }
   0x6   :  { %s872_s14 = smov 0   ;;  %s874_s15 = smov 0  }
   0x7 LB: > { %s889_s16 = sadd.s32 4294967295, %s838_s15   ;;  %s559_s17 = sadd.s32 4294967294, %s838_s15   ;;  %s838_s15 = sphi %s874_s15, %s1334_s15   ;;  %s834_s14 = sphi %s872_s14, %s1333_s14   ;;  %s830_s13 = sphi %s870_s13, %s1332_s13   ;;  %s826_s12 = sphi %s868_s12, %s1331_s12  }
   0x8   : > { %s893_s18 = sadd.s32 1, %s838_s15   ;;  %s70_s19 = sadd.s32 1, %s834_s14 }
   0x9   : > { %s67_s20 = ssub.s32 %s838_s15, %s893_s18  ;;  %p77_p0 = scmp.ne.s32.totalorder %s834_s14, %s830_s13 }
   0xa   : > { %p68_p1 = scmp.eq.s32.totalorder %s67_s20, 0  ;;  %p78_p2 = scmp.eq.s32.totalorder %s838_s15, 0 }
   0xb   : > { %p83_p3 = scmp.ne.s32.totalorder %s830_s13, %s826_s12  ;;  %p1309_p4 = scmp.eq.s32.totalorder %s889_s16, 0 }
   0xc   : > { %s905_s21 = scalar_select %p68_p1, %s834_s14, %s70_s19  }
   0xd   : > { %p907_p5 = por %p78_p2, %p77_p0  ;;  %p913_p6 = por %p1309_p4, %p83_p3 }
   0xe   : > { %p107_p7 = scmp.eq.s32.totalorder %s889_s16, 1  ;;  %p113_p8 = scmp.eq.s32.totalorder %s559_s17, 1 }
   0xf   : > { %s1315_s23 = scalar_select %p913_p6, 1, 0 }
  0x10   : > { %p560_p9 = scmp.ge.s32.totalorder %s838_s15, 1  ;;  %p120_p10 = scmp.lt.s32.totalorder %s838_s15, 3 }
  0x11   : > { %p920_p11 = por %p107_p7, %p77_p0  ;;  %p924_p12 = por %p113_p8, %p83_p3 }
  0x12   : > { %p928_p13 = pnand %p560_p9, %p120_p10  ;;  %s133_s29 = sshll.u32 %s1305_s0, 4  ;;  %s134_s29 = int_to_ptr.vmem [resolvable:$true] %s133_s29 }
  0x13   : > { %s1316_s24 = scalar_select %p920_p11, 1, 0 }
  0x14   : > { %s1317_s25 = scalar_select %p924_p12, 1, 0 }
  0x15   : > { %s1318_s26 = scalar_select %p928_p13, 1, 0 }
  0x16   : > { %p645_p1 = pneg %p928_p13  ;;  %p662_p2 = scmp.lt.s32.totalorder %s838_s15, 2 }
  0x17   : > { %s144_s6 = sshll.u32 %s1306_s1, 4  ;;  %s704_s8 = scalar_lea.vmem %s134_s29, 16  ;;  %s145_s6 = int_to_ptr.vmem [resolvable:$true] %s144_s6 }
  0x18   : > { %p941_p7 = pnand %p645_p1, %p1309_p4  ;;  %p950_p3 = pnand %p662_p2, %p907_p5 }
  0x19   : > { %p705_p8 = scmp.ne.s32.totalorder %s134_s29, %s704_s8  ;;  %p712_p0 = scmp.lt.s32.totalorder %s134_s29, %s134_s29 }
  0x1a   : > { %s1320_s7 = scalar_select %p950_p3, 1, 0 }
  0x1b   : > { %p706_p9 = pneg %p941_p7  ;;  %p713_p4 = scmp.lt.s32.totalorder %s704_s8, %s704_s8 }
  0x1d   : > { %p707_p10 = pnand %p706_p9, %p705_p8  ;;  %p714_p12 = por %p713_p4, %p712_p0 }
  0x1f   : > { %p708_p1 = pneg %p707_p10 }
  0x21   : > { %p715_p11 = pnand %p714_p12, %p708_p1 }
  0x23   : > { %718 = shalt.err (!%p715_p11)
}
  0x24   : > { %s840_s9 = smov [#allocation2]   ;;  %s155_s10 = sand.u32 1, %s834_s14  }
  0x25   : > { %648 = dma.vmem_to_smem (!%p941_p7), %s134_s29, 16, %s840_s9, [#allocation5]  }
  0x26   : > { %s719_s11 = scalar_lea.vmem %s145_s6, 16  ;;  %p727_p8 = scmp.lt.s32.totalorder %s145_s6, %s145_s6 }
  0x27   : > { %p720_p5 = scmp.ne.s32.totalorder %s145_s6, %s719_s11  ;;  %p728_p10 = scmp.lt.s32.totalorder %s719_s11, %s719_s11 }
  0x29   : > { %p722_p2 = pnand %p720_p5, %p706_p9  ;;  %p729_p13 = por %p728_p10, %p727_p8 }
  0x2b   : > { %p723_p6 = pneg %p722_p2 }
  0x2d   : > { %p730_p3 = pnand %p729_p13, %p723_p6 }
  0x2f   : > { %733 = shalt.err (!%p730_p3)
}
  0x30   : > { %s841_s17 = smov [#allocation6]   ;;  %s564_s19 = sshll.u32 %s155_s10, 7 }
  0x31   : > { %651 = dma.vmem_to_smem (!%p941_p7), %s145_s6, 16, %s841_s17, [#allocation7]  }
  0x32   : > { %s631_s20 = sshll.u32 %s838_s15, 11  ;;  %s159_s29 = scalar_lea.vmem [#allocation8], %s564_s19 }
  0x33   : > { %s971_s28 = scalar_lea.hbm %s1307_s2, %s631_s20  ;;  %s166_s4 = sshll.u32 %s159_s29, 4  ;;  %s973_s4 = int_to_ptr.vmem [resolvable:$true] %s166_s4 }
  0x34   : > { %s975_s30 = scalar_lea.sflag [#allocation3], %s155_s10  ;;  %s734_s5 = scalar_lea.hbm %s971_s28, 2048 }
  0x35   : > { %p735_p4 = scmp.ne.s32.totalorder %s971_s28, %s734_s5  ;;  %p1321_p6 = scmp.ne.s32.totalorder %s1320_s7, 0 }
  0x36   : > { %s739_s9 = scalar_lea.hbm %s1307_s2, 4096  ;;  %p740_p0 = scmp.lt.u32.totalorder %s971_s28, %s1307_s2 }
  0x37   : > { %p736_p11 = pneg %p1321_p6  ;;  %p741_p7 = scmp.lt.u32.totalorder %s739_s9, %s734_s5 }
  0x38   : > { %p743_p9 = scmp.lt.u32.totalorder %s734_s5, %s971_s28 }
  0x39   : > { %p737_p12 = pnand %p736_p11, %p735_p4  ;;  %p742_p3 = por %p741_p7, %p740_p0 }
  0x3b   : > { %p738_p13 = pneg %p737_p12  ;;  %p744_p1 = por %p743_p9, %p742_p3 }
  0x3d   : > { %p745_p5 = pnand %p744_p1, %p738_p13 }
  0x3f   : > { %748 = shalt.err (!%p745_p5)
}
  0x40   : > { %s749_s10 = scalar_lea.vmem %s973_s4, 2048  ;;  %s842_s19 = smov [#allocation8]  }
  0x41   : > { %p750_p2 = scmp.ne.s32.totalorder %s973_s4, %s749_s10  ;;  %s754_s20 = sshll.u32 %s842_s19, 4  ;;  %s755_s20 = int_to_ptr.vmem [resolvable:$false] %s754_s20 }
  0x42   : > { %s756_s22 = scalar_lea.vmem %s755_s20, 4096  ;;  %p757_p4 = scmp.lt.s32.totalorder %s973_s4, %s755_s20 }
  0x43   : > { %p752_p8 = pnand %p750_p2, %p736_p11  ;;  %p758_p12 = scmp.lt.s32.totalorder %s756_s22, %s749_s10 }
  0x45   : > { %p753_p10 = pneg %p752_p8  ;;  %p759_p0 = por %p758_p12, %p757_p4 }
  0x47   : > { %p760_p7 = pnand %p759_p0, %p753_p10 }
  0x49   : > { %763 = shalt.err (!%p760_p7)
}
  0x4a   : > { %s843_s27 = smov 128   ;;  %s844_s29 = smov 8  }
  0x4b   : > { %655 = dma.hbm_to_vmem [thread:$0]  (!%p1321_p6), %s971_s28, 2048, %s973_s4, %s975_s30, %s843_s27, %s843_s27, %s844_s29  }
  0x4c   : > { %p1322_p11 = scmp.ne.s32.totalorder %s1318_s26, 0 }
  0x4d   : > { %p1323_p13 = scmp.eq.s32.totalorder (!%p1322_p11), %s889_s16, 0 }
  0x4e   : > { %178 = sbr.rel (%p1322_p11) target bundleno = 168 (0xa8), region = 32 }
  0x55   : > { %809 = dma.done.wait (%p1323_p13), [#allocation5], 16   ;;  %p1324_p3 = pmov %p1323_p13 }
  0x57   : > { %811 = vsyncadd (%p1324_p3), [#allocation5], 4294967280  ;;  %p1325_p9 = pmov %p1324_p3 }
  0x58   : > { %p1326_p1 = pmov %p1324_p3 }
  0x59   : > { %813 = dma.done.wait (%p1325_p9), [#allocation7], 16  }
  0x5a   : > { %815 = vsyncadd (%p1326_p1), [#allocation7], 4294967280  ;;  %s1014_s5 = sand.u32 1, %s830_s13   ;;  %p1327_p6 = scmp.ne.s32.totalorder %s1315_s23, 0 }
  0x5b   : > { %s570_s26 = sshll.u32 %s1014_s5, 7  ;;  %s189_s7 = scalar_lea.sflag [#allocation3], %s1014_s5 }
  0x5c   : > { %s1018_s28 = scalar_lea.vmem [#allocation8], %s570_s26 }
  0x5d   : > { %817 = dma.done.wait (%p1327_p6), %s189_s7, 2048  }
  0x5e   : > { %819 = vsyncadd (%p1327_p6), %s189_s7, 4294965248 }
  0x5f   : > { %197 = sfence }
  0x60   : > { %s239_s4 = sld [smem:[#allocation2]]  ;;  %s1026_s6 = sld [smem:[#allocation2 + $0x1]]  ;;  %v1035_v0 = vld [vmem:[%s1018_s28] sm:$0xff]  ;;  %v1042_v1 = vld [vmem:[%s1018_s28 + $0x8] sm:$0xff]  ;;  %v1045_v2 = vld [vmem:[%s1018_s28 + $0x10] sm:$0xff] }
  0x61   : > { %s1024_s30 = sld [smem:[#allocation6]]  ;;  %s1028_s8 = sld [smem:[#allocation2 + $0x2]]  ;;  %v1048_v3 = vld [vmem:[%s1018_s28 + $0x20] sm:$0xff]  ;;  %v1061_v7 = vld [vmem:[%s1018_s28 + $0x30] sm:$0xff]  ;;  %v1078_v17 = vld [vmem:[%s1018_s28 + $0x18] sm:$0xff] }
  0x62   : > { %s1030_s9 = sld [smem:[#allocation2 + $0x3]]  ;;  %s1032_s11 = sld [smem:[#allocation2 + $0x4]]  ;;  %v1064_v8 = vld [vmem:[%s1018_s28 + $0x40] sm:$0xff]  ;;  %v1072_v12 = vld [vmem:[%s1018_s28 + $0x50] sm:$0xff]  ;;  %v1081_v18 = vld [vmem:[%s1018_s28 + $0x28] sm:$0xff] }
  0x63   : > { %s1037_s23 = sld [smem:[#allocation2 + $0x5]]  ;;  %s1039_s17 = sld [smem:[#allocation2 + $0x6]]  ;;  %v1086_v19 = vld [vmem:[%s1018_s28 + $0x60] sm:$0xff]  ;;  %v1093_v25 = vld [vmem:[%s1018_s28 + $0x38] sm:$0xff]  ;;  %v1096_v26 = vld [vmem:[%s1018_s28 + $0x48] sm:$0xff] }
  0x64   : > { %s1050_s10 = sld [smem:[#allocation2 + $0x7]]  ;;  %s1052_s19 = sld [smem:[#allocation2 + $0x8]]  ;;  %v1112_v34 = vld [vmem:[%s1018_s28 + $0x70] sm:$0xff]  ;;  %v1116_v36 = vld [vmem:[%s1018_s28 + $0x58] sm:$0xff]  ;;  %v1121_v41 = vld [vmem:[%s1018_s28 + $0x68] sm:$0xff] }
  0x65   : > { %s1056_s20 = sld [smem:[#allocation6 + $0x1]]  ;;  %s1069_s27 = sld [smem:[#allocation2 + $0xa]]  ;;  %v1127_v45 = vld [vmem:[%s1018_s28 + $0x78] sm:$0xff] }
  0x66   : > { %v240_v4 = vstv %s239_s4  ;;  %s1058_s22 = sld [smem:[#allocation2 + $0x9]]  ;;  %v248_v9 = vstv %s1026_s6  ;;  %s1083_s29 = sld [smem:[#allocation2 + $0xb]] }
  0x67   : > { %v241_v5 = vmul.f32 %v240_v4, %v1035_v0  ;;  %v244_v6 = vstv %s1024_s30  ;;  %v254_v10 = vstv %s1028_s8  ;;  %v242_v11 = vmul.f32 %v240_v4, %v1042_v1  ;;  %s1098_s26 = sld [smem:[#allocation2 + $0xc]]  ;;  %s1100_s7 = sld [smem:[#allocation2 + $0xd]] }
  0x68   : > { %v249_v14 = vmul.f32 %v1045_v2, %v248_v9  ;;  %v255_v15 = vmul.f32 %v1048_v3, %v254_v10  ;;  %v260_v16 = vstv %s1030_s9  ;;  %v266_v20 = vstv %s1032_s11  ;;  %s1104_s4 = sld [smem:[#allocation2 + $0xe]]  ;;  %s1109_s30 = sld [smem:[#allocation2 + $0xf]] }
  0x69   : > { %v245_v13 = vadd.f32 %v244_v6, %v241_v5  ;;  %v272_v21 = vstv %s1037_s23  ;;  %v278_v22 = vstv %s1039_s17  ;;  %v261_v24 = vmul.f32 %v1061_v7, %v260_v16  ;;  %s1132_s6 = sld [smem:[#allocation2 + $0x10]]  ;;  %s1137_s8 = sld [smem:[#allocation6 + $0x2]] }
  0x6a   : > { %v246_v27 = vadd.f32 %v244_v6, %v242_v11  ;;  %v250_v28 = vmul.f32 %v1078_v17, %v248_v9  ;;  %v256_v29 = vmul.f32 %v1081_v18, %v254_v10  ;;  %v267_v31 = vmul.f32 %v1064_v8, %v266_v20  ;;  %s1139_s28 = sld [smem:[#allocation2 + $0x11]]  ;;  %s571_s9 = sshll.u32 %s1014_s5, 6 }
  0x6b   : > { %v251_v23 = vadd.f32 %v249_v14, %v245_v13  ;;  %v273_v32 = vmul.f32 %v1072_v12, %v272_v21  ;;  %v279_v33 = vmul.f32 %v1086_v19, %v278_v22  ;;  %v284_v35 = vstv %s1050_s10  ;;  %s1147_s11 = sld [smem:[#allocation2 + $0x12]]  ;;  %s1149_s23 = sld [smem:[#allocation2 + $0x13]] }
  0x6c   : > { %v252_v37 = vadd.f32 %v250_v28, %v246_v27  ;;  %v262_v38 = vmul.f32 %v1093_v25, %v260_v16  ;;  %v268_v39 = vmul.f32 %v1096_v26, %v266_v20  ;;  %v292_v42 = vstv %s1052_s19  ;;  %s1156_s17 = sld [smem:[#allocation2 + $0x14]]  ;;  %s1160_s10 = sld [smem:[#allocation2 + $0x15]] }
  0x6d   : > { %v257_v30 = vadd.f32 %v255_v15, %v251_v23  ;;  %v296_v43 = vstv %s1056_s20  ;;  %v300_v44 = vstv %s1058_s22  ;;  %v293_v47 = vmul.f32 %v292_v42, %v1035_v0  ;;  %s1162_s19 = sld [smem:[#allocation2 + $0x16]]  ;;  %s1166_s20 = sld [smem:[#allocation2 + $0x17]] }
  0x6e   : > { %v258_v46 = vadd.f32 %v256_v29, %v252_v37  ;;  %v301_v48 = vmul.f32 %v1045_v2, %v300_v44  ;;  %v306_v49 = vstv %s1069_s27  ;;  %v285_v51 = vmul.f32 %v1112_v34, %v284_v35  ;;  %s1172_s22 = scalar_lea.vmem [#allocation9], %s571_s9  ;;  %s1183_s27 = sld [smem:[#allocation2 + $0x18]] }
  0x6f   : > { %v263_v40 = vadd.f32 %v261_v24, %v257_v30  ;;  %v274_v52 = vmul.f32 %v1116_v36, %v272_v21  ;;  %v312_v53 = vstv %s1083_s29  ;;  %v280_v55 = vmul.f32 %v1121_v41, %v278_v22  ;;  %s1185_s29 = sld [smem:[#allocation6 + $0x3]]  ;;  %s464_s9 = sshll.u32 %s1172_s22, 4  ;;  %s1255_s9 = int_to_ptr.vmem [resolvable:$true] %s464_s9 }
  0x70   : > { %v264_v54 = vadd.f32 %v262_v38, %v258_v46  ;;  %v297_v56 = vadd.f32 %v296_v43, %v293_v47  ;;  %v307_v57 = vmul.f32 %v1048_v3, %v306_v49  ;;  %v286_v59 = vmul.f32 %v1127_v45, %v284_v35  ;;  %p1328_p2 = scmp.ne.s32.totalorder %s1316_s24, 0 }
  0x71   : > { %v269_v50 = vadd.f32 %v267_v31, %v263_v40  ;;  %v318_v60 = vstv %s1098_s26  ;;  %v324_v61 = vstv %s1100_s7  ;;  %v313_v4 = vmul.f32 %v1061_v7, %v312_v53  ;;  %s1190_s26 = sld [smem:[#allocation2 + $0x19]]  ;;  %s1192_s7 = sld [smem:[#allocation2 + $0x1a]] }
  0x72   : > { %v270_v62 = vadd.f32 %v268_v39, %v264_v54  ;;  %v303_v63 = vadd.f32 %v301_v48, %v297_v56  ;;  %v330_v5 = vstv %s1104_s4  ;;  %v336_v9 = vstv %s1109_s30  ;;  %s1199_s4 = sld [smem:[#allocation2 + $0x1b]]  ;;  %s1204_s30 = sld [smem:[#allocation2 + $0x1c]] }
  0x73   : > { %v275_v58 = vadd.f32 %v273_v32, %v269_v50  ;;  %v294_v10 = vmul.f32 %v292_v42, %v1042_v1  ;;  %v302_v11 = vmul.f32 %v1078_v17, %v300_v44  ;;  %v319_v15 = vmul.f32 %v1064_v8, %v318_v60 }
  0x74   : > { %v276_v13 = vadd.f32 %v274_v52, %v270_v62  ;;  %v309_v14 = vadd.f32 %v307_v57, %v303_v63  ;;  %v325_v16 = vmul.f32 %v1072_v12, %v324_v61  ;;  %v331_v21 = vmul.f32 %v1086_v19, %v330_v5 }
  0x75   : > { %v281_v6 = vadd.f32 %v279_v33, %v275_v58  ;;  %v298_v22 = vadd.f32 %v296_v43, %v294_v10  ;;  %v308_v23 = vmul.f32 %v1081_v18, %v306_v49  ;;  %v337_v28 = vmul.f32 %v1112_v34, %v336_v9 }
  0x76   : > { %v282_v24 = vadd.f32 %v280_v55, %v276_v13  ;;  %v315_v27 = vadd.f32 %v313_v4, %v309_v14  ;;  %v314_v29 = vmul.f32 %v1093_v25, %v312_v53  ;;  %v345_v31 = vstv %s1132_s6  ;;  %s1210_s6 = sld [smem:[#allocation2 + $0x1d]] }
  0x77   : > { %v287_v20 = vadd.f32 %v285_v51, %v281_v6  ;;  %v304_v30 = vadd.f32 %v302_v11, %v298_v22  ;;  %v349_v32 = vstv %s1137_s8  ;;  %v353_v33 = vstv %s1139_s28  ;;  %s1218_s8 = sld [smem:[#allocation2 + $0x1e]]  ;;  %s1225_s28 = sld [smem:[#allocation2 + $0x1f]] }
  0x78   : > { %v288_v35 = vadd.f32 %v286_v59, %v282_v24  ;;  %v321_v37 = vadd.f32 %v319_v15, %v315_v27  ;;  %v346_v38 = vmul.f32 %v345_v31, %v1035_v0  ;;  %v354_v39 = vmul.f32 %v1045_v2, %v353_v33 }
  0x79   : > { %289 = vst [vmem:[%s1172_s22] sm:$0xff] %v287_v20  ;;  %v310_v40 = vadd.f32 %v308_v23, %v304_v30  ;;  %v320_v42 = vmul.f32 %v1096_v26, %v318_v60  ;;  %v359_v43 = vstv %s1147_s11  ;;  %v365_v44 = vstv %s1149_s23  ;;  %s632_s11 = sshll.u32 %s889_s16, 10  ;;  %s845_s16 = smov [#allocation9]  }
  0x7a   : > { %290 = vst [vmem:[%s1172_s22 + $0x8] sm:$0xff] %v288_v35  ;;  %v327_v46 = vadd.f32 %v325_v16, %v321_v37  ;;  %v326_v47 = vmul.f32 %v1116_v36, %v324_v61  ;;  %v350_v48 = vadd.f32 %v349_v32, %v346_v38  ;;  %v360_v49 = vmul.f32 %v1048_v3, %v359_v43 }
  0x7b   : > { %v316_v50 = vadd.f32 %v314_v29, %v310_v40  ;;  %v332_v51 = vmul.f32 %v1121_v41, %v330_v5  ;;  %v366_v52 = vmul.f32 %v1061_v7, %v365_v44  ;;  %v371_v53 = vstv %s1156_s17 }
  0x7c   : > { %v333_v54 = vadd.f32 %v331_v21, %v327_v46  ;;  %v356_v55 = vadd.f32 %v354_v39, %v350_v48  ;;  %v377_v56 = vstv %s1160_s10  ;;  %v383_v57 = vstv %s1162_s19  ;;  %s1260_s10 = scalar_lea.hbm %s1308_s3, %s632_s11  ;;  %s451_s19 = scalar_lea.sflag [#allocation4], %s1014_s5 }
  0x7d   : > { %v322_v58 = vadd.f32 %v320_v42, %v316_v50  ;;  %v389_v59 = vstv %s1166_s20  ;;  %v347_v60 = vmul.f32 %v345_v31, %v1042_v1  ;;  %v355_v61 = vmul.f32 %v1078_v17, %v353_v33  ;;  %s764_s20 = scalar_lea.vmem %s1255_s9, 1024 }
  0x7e   : > { %v339_v62 = vadd.f32 %v337_v28, %v333_v54  ;;  %v338_v63 = vmul.f32 %v1127_v45, %v336_v9  ;;  %v362_v4 = vadd.f32 %v360_v49, %v356_v55  ;;  %v372_v5 = vmul.f32 %v1064_v8, %v371_v53  ;;  %p765_p5 = scmp.ne.s32.totalorder %s1255_s9, %s764_s20 }
  0x7f   : > { %v328_v6 = vadd.f32 %v326_v47, %v322_v58  ;;  %v378_v10 = vmul.f32 %v1072_v12, %v377_v56  ;;  %v351_v11 = vadd.f32 %v349_v32, %v347_v60  ;;  %v361_v13 = vmul.f32 %v1081_v18, %v359_v43 }
  0x80   : > { %602 = vst [vmem:[%s1172_s22 + $0x10] sm:$0xff] %v339_v62  ;;  %v368_v14 = vadd.f32 %v366_v52, %v362_v4  ;;  %v384_v15 = vmul.f32 %v1086_v19, %v383_v57  ;;  %v390_v9 = vmul.f32 %v1112_v34, %v389_v59  ;;  %v367_v16 = vmul.f32 %v1093_v25, %v365_v44  ;;  %p766_p8 = pnand %p765_p5, %p1328_p2 }
  0x81   : > { %v334_v20 = vadd.f32 %v332_v51, %v328_v6  ;;  %v357_v21 = vadd.f32 %v355_v61, %v351_v11  ;;  %v398_v22 = vstv %s1183_s27  ;;  %v402_v23 = vstv %s1185_s29  ;;  %s768_s27 = sshll.u32 %s845_s16, 4  ;;  %s769_s27 = int_to_ptr.vmem [resolvable:$false] %s768_s27 }
  0x82   : > { %v374_v24 = vadd.f32 %v372_v5, %v368_v14  ;;  %v399_v27 = vmul.f32 %v398_v22, %v1035_v0  ;;  %v406_v28 = vstv %s1190_s26  ;;  %v412_v29 = vstv %s1192_s7  ;;  %p767_p10 = pneg %p766_p8  ;;  %s770_s29 = scalar_lea.vmem %s769_s27, 2048 }
  0x83   : > { %v340_v30 = vadd.f32 %v338_v63, %v334_v20  ;;  %v363_v31 = vadd.f32 %v361_v13, %v357_v21  ;;  %v373_v32 = vmul.f32 %v1096_v26, %v371_v53  ;;  %v407_v33 = vmul.f32 %v1045_v2, %v406_v28  ;;  %p771_p4 = scmp.lt.s32.totalorder %s1255_s9, %s769_s27  ;;  %p772_p12 = scmp.lt.s32.totalorder %s770_s29, %s764_s20 }
  0x84   : > { %v380_v35 = vadd.f32 %v378_v10, %v374_v24  ;;  %v403_v37 = vadd.f32 %v402_v23, %v399_v27  ;;  %v413_v38 = vmul.f32 %v1048_v3, %v412_v29  ;;  %v418_v39 = vstv %s1199_s4 }
  0x85   : > { %603 = vst [vmem:[%s1172_s22 + $0x18] sm:$0xff] %v340_v30  ;;  %v369_v40 = vadd.f32 %v367_v16, %v363_v31  ;;  %v379_v0 = vmul.f32 %v1116_v36, %v377_v56  ;;  %v424_v42 = vstv %s1204_s30  ;;  %v385_v44 = vmul.f32 %v1121_v41, %v383_v57  ;;  %p773_p0 = por %p772_p12, %p771_p4 }
  0x86   : > { %v386_v43 = vadd.f32 %v384_v15, %v380_v35  ;;  %v409_v46 = vadd.f32 %v407_v33, %v403_v37  ;;  %v419_v2 = vmul.f32 %v1061_v7, %v418_v39  ;;  %v391_v48 = vmul.f32 %v1127_v45, %v389_v59 }
  0x87   : > { %v375_v47 = vadd.f32 %v373_v32, %v369_v40  ;;  %v430_v49 = vstv %s1210_s6  ;;  %v400_v3 = vmul.f32 %v398_v22, %v1042_v1  ;;  %v425_v52 = vmul.f32 %v1064_v8, %v424_v42  ;;  %p774_p7 = pnand %p773_p0, %p767_p10 }
  0x88   : > { %v392_v50 = vadd.f32 %v390_v9, %v386_v43  ;;  %v415_v51 = vadd.f32 %v413_v38, %v409_v46  ;;  %v408_v53 = vmul.f32 %v1078_v17, %v406_v28  ;;  %v436_v55 = vstv %s1218_s8 }
  0x89   : > { %v381_v54 = vadd.f32 %v379_v0, %v375_v47  ;;  %v404_v56 = vadd.f32 %v402_v23, %v400_v3  ;;  %v414_v57 = vmul.f32 %v1081_v18, %v412_v29  ;;  %v431_v58 = vmul.f32 %v1072_v12, %v430_v49 }
  0x8a   : > { %613 = vst [vmem:[%s1172_s22 + $0x20] sm:$0xff] %v392_v50  ;;  %v421_v7 = vadd.f32 %v419_v2, %v415_v51  ;;  %v442_v60 = vstv %s1225_s28  ;;  %v420_v61 = vmul.f32 %v1093_v25, %v418_v39  ;;  %v437_v8 = vmul.f32 %v1086_v19, %v436_v55 }
  0x8b   : > { %v387_v59 = vadd.f32 %v385_v44, %v381_v54  ;;  %v410_v1 = vadd.f32 %v408_v53, %v404_v56  ;;  %v426_v4 = vmul.f32 %v1096_v26, %v424_v42  ;;  %v443_v5 = vmul.f32 %v1112_v34, %v442_v60 }
  0x8c   : > { %v427_v62 = vadd.f32 %v425_v52, %v421_v7  ;;  %v432_v6 = vmul.f32 %v1116_v36, %v430_v49  ;;  %v438_v19 = vmul.f32 %v1121_v41, %v436_v55  ;;  %v444_v14 = vmul.f32 %v1127_v45, %v442_v60 }
  0x8d   : > { %v393_v17 = vadd.f32 %v391_v48, %v387_v59  ;;  %v416_v63 = vadd.f32 %v414_v57, %v410_v1 }
  0x8e   : > { %v433_v18 = vadd.f32 %v431_v58, %v427_v62 }
  0x8f   : > { %614 = vst [vmem:[%s1172_s22 + $0x28] sm:$0xff] %v393_v17  ;;  %v422_v12 = vadd.f32 %v420_v61, %v416_v63 }
  0x90   : > { %v439_v10 = vadd.f32 %v437_v8, %v433_v18 }
  0x91   : > { %v428_v25 = vadd.f32 %v426_v4, %v422_v12 }
  0x92   : > { %v445_v11 = vadd.f32 %v443_v5, %v439_v10 }
  0x93   : > { %v434_v13 = vadd.f32 %v432_v6, %v428_v25 }
  0x94   : > { %624 = vst [vmem:[%s1172_s22 + $0x30] sm:$0xff] %v445_v11 }
  0x95   : > { %v440_v26 = vadd.f32 %v438_v19, %v434_v13 }
  0x97   : > { %v446_v34 = vadd.f32 %v444_v14, %v440_v26 }
  0x99   : > { %625 = vst [vmem:[%s1172_s22 + $0x38] sm:$0xff] %v446_v34 }
  0x9a   : > { %777 = shalt.err (!%p774_p7)
}
  0x9b   : > { %s778_s22 = scalar_lea.hbm %s1260_s10, 1024  ;;  %s782_s4 = scalar_lea.hbm %s1308_s3, 2048 }
  0x9c   : > { %p779_p11 = scmp.ne.s32.totalorder %s1260_s10, %s778_s22  ;;  %p783_p9 = scmp.lt.u32.totalorder %s1260_s10, %s1308_s3 }
  0x9d   : > { %p784_p1 = scmp.lt.u32.totalorder %s782_s4, %s778_s22  ;;  %p786_p5 = scmp.lt.u32.totalorder %s778_s22, %s1260_s10 }
  0x9e   : > { %p780_p13 = pnand %p779_p11, %p1328_p2 }
  0x9f   : > { %p785_p6 = por %p784_p1, %p783_p9 }
  0xa0   : > { %p781_p3 = pneg %p780_p13 }
  0xa1   : > { %p787_p8 = por %p786_p5, %p785_p6 }
  0xa3   : > { %p788_p10 = pnand %p787_p8, %p781_p3 }
  0xa5   : > { %791 = shalt.err (!%p788_p10)
}
  0xa6   : > { %s846_s8 = smov 128   ;;  %s847_s28 = smov 8  }
  0xa7   : > { %643 = dma.vmem_to_hbm [thread:$0]  (%p1328_p2), %s1255_s9, 1024, %s1260_s10, %s451_s19, %s846_s8, %s846_s8, %s847_s28  }
  0xa8 PF: > { %s479_s11 = sand.u32 1, %s826_s12   ;;  %p1329_p4 = scmp.ne.s32.totalorder %s1317_s25, 0 }
  0xa9   : > { %p1330_p12 = scmp.ge.s32.totalorder %s838_s15, 2  ;;  %s480_s23 = scalar_lea.sflag [#allocation4], %s479_s11 }
  0xab   : > { %p657_p0 = pnand %p1330_p12, %p1329_p4 }
  0xad   : > { %821 = dma.done.wait (!%p657_p0), %s480_s23, 1024  }
  0xae   : > { %823 = vsyncadd (!%p657_p0), %s480_s23, 4294966272  ;;  %p18_p7 = scmp.ge.s32.totalorder %s893_s18, 4   ;;  %s1331_s12 = smov %s830_s13 }
  0xaf   : > { %s1332_s13 = smov %s834_s14  ;;  %s1333_s14 = smov %s905_s21 }
  0xb0   : > { %s1334_s15 = smov %s893_s18  ;;  %20 = sbr.rel (!%p18_p7) target bundleno = 7 (0x7), region = 96 }
  0xb7   :  { %485 = vsyncpa [#allocation3], 1 }
  0xb8   :  { %487 = vsyncpa [#allocation3 + $0x1], 1 }
  0xb9   :  { %488 = vsyncpa [#allocation4], 1 }
  0xba   :  { %490 = vsyncpa [#allocation4 + $0x1], 1 }
  0xbb   :  { %491 = vsyncpa [#allocation5], 1 }
  0xbc   :  { %493 = vsyncpa [#allocation5 + $0x1], 1 }
  0xbd   :  { %494 = vsyncpa [#allocation7], 1 }

</bundles_post_ra>
